<compile_context>
chip_gen: v7x
topology: tpu7x:2x2x1
jax: 0.10.0
libtpu: 0.0.40
codegen_flags: <defaults>
</compile_context>

<pallas_src>
import functools

import jax
import jax.numpy as jnp
from jax.experimental import pallas as pl
from jax.experimental.pallas import tpu as pltpu


def _avg_kernel(x_ref, o_ref, *, inv_c):
    # x_ref: (1, TL, C) tile of src (original NLC layout); o_ref: (1, TL, 1) tile of the mean.
    x = x_ref[0].astype(jnp.float32)                        # (TL, C), f32 accumulation
    o_ref[0] = jnp.sum(x, axis=-1, keepdims=True) * inv_c   # (TL, 1)


def _window_kernel(*refs, window_size, tile):
    # refs[:-1]: lane-dense (1, 1, BW) blocks of the padded mean (current tile + halo tiles)
    # refs[-1]:  (1, W, TL) output tile
    o_ref = refs[-1]
    parts = [r[0] for r in refs[:-1]]                       # each (1, BW)
    window = parts[0] if len(parts) == 1 else jnp.concatenate(parts, axis=-1)
    for k in range(window_size):                            # static unroll, per-row stores
        o_ref[:, k, :] = window[:, k:k + tile].astype(o_ref.dtype)


def _pick_seq_tile(seq_len, channels, itemsize):
    """Lane-dense sequence tile: multiple of 128 dividing L (or L itself), VMEM-safe on v7x."""
    if seq_len % 128 != 0:
        return seq_len                                      # small / ragged L -> one full tile
    for cand in (2048, 1024, 512, 256, 128):
        if seq_len % cand == 0 and cand * channels * itemsize <= 4 * 1024 * 1024:
            return cand
    return 128


def nearest_neighbors_embed(src, window_size):
    """src: (N, L, C). Returns (N, W, L) == NearestNeighborsEmbed(C, W)(src)."""
    if window_size % 2 == 0:
        # PyTorch Conv1d(1, W, k=W, pad=W//2) yields length L+1 for even W; not supported here.
        raise ValueError("window_size must be odd")
    N, L, C = src.shape
    pad = window_size // 2
    isz = jnp.dtype(src.dtype).itemsize
    tl = _pick_seq_tile(L, C, isz)
    n_lt = L // tl
    inv_c = 1.0 / C

    # ---- Pass 1: channel average (reads NLC directly, no transpose) -------------------------
    vmem_a = 2 * tl * max(C * isz, 512) + 2 * tl * 512 + (8 << 20)
    avg = pl.pallas_call(
        functools.partial(_avg_kernel, inv_c=inv_c),
        out_shape=jax.ShapeDtypeStruct((N, L, 1), jnp.float32),
        grid_spec=pltpu.PrefetchScalarGridSpec(
            num_scalar_prefetch=0,
            grid=(N, n_lt),
            in_specs=[pl.BlockSpec((1, tl, C), lambda n, t: (n, t, 0))],
            out_specs=pl.BlockSpec((1, tl, 1), lambda n, t: (n, t, 0)),
        ),
        compiler_params=pltpu.CompilerParams(
            dimension_semantics=("parallel", "parallel"),
            vmem_limit_bytes=int(min(48 << 20, max(32 << 20, vmem_a))),
        ),
        cost_estimate=pl.CostEstimate(
            flops=N * L * C,
            transcendentals=0,
            bytes_accessed=N * L * C * isz + N * L * 4,
        ),
    )(src)

    # ---- tiny glue: zero-pad the (N, L) mean so every output tile sees its halo through whole,
    # tile-aligned blocks (all in-kernel slicing stays static; no overlapping BlockSpecs needed).
    n_extra = (-(-(2 * pad) // tl)) if pad > 0 else 0       # ceil(2*pad / tl)
    if n_lt == 1:
        n_halo = 1
        blk_w = L + 2 * pad                                 # single block = full padded row
        l_pad = blk_w
    else:
        n_halo = 1 + n_extra
        blk_w = tl                                          # tl is a multiple of 128 here
        l_pad = (n_lt + n_extra) * tl
    avg_padded = jnp.pad(avg.reshape(N, L), ((0, 0), (pad, l_pad - L - pad)))
    avg_padded = avg_padded.reshape(N, 1, l_pad)

    # ---- Pass 2: W shifted copies of the mean (lane-dense output tiles) ----------------------
    in_specs = [
        pl.BlockSpec((1, 1, blk_w), (lambda n, t, j=j: (n, 0, t + j)))
        for j in range(n_halo)
    ]
    vmem_b = 2 * n_halo * blk_w * 4 + 2 * window_size * tl * isz + (8 << 20)
    out = pl.pallas_call(
        functools.partial(_window_kernel, window_size=window_size, tile=tl),
        out_shape=jax.ShapeDtypeStruct((N, window_size, L), src.dtype),
        grid_spec=pltpu.PrefetchScalarGridSpec(
            num_scalar_prefetch=0,
            grid=(N, n_lt),
            in_specs=in_specs,
            out_specs=pl.BlockSpec((1, window_size, tl), lambda n, t: (n, 0, t)),
        ),
        compiler_params=pltpu.CompilerParams(
            dimension_semantics=("parallel", "parallel"),
            vmem_limit_bytes=int(min(48 << 20, max(32 << 20, vmem_b))),
        ),
        cost_estimate=pl.CostEstimate(
            flops=N * window_size * L,
            transcendentals=0,
            bytes_accessed=N * n_lt * n_halo * blk_w * 4 + N * window_size * L * isz,
        ),
    )(*([avg_padded] * n_halo))
    return out


def _reference(src, window_size):
    # Plain-JAX reference mirroring the PyTorch module.
    N, L, C = src.shape
    pad = window_size // 2
    avg = jnp.mean(src.astype(jnp.float32), axis=-1)                 # (N, L)
    avg_pad = jnp.pad(avg, ((0, 0), (pad, pad)))                     # (N, L + 2*pad)
    rows = [avg_pad[:, k:k + L] for k in range(window_size)]
    return jnp.stack(rows, axis=1).astype(src.dtype)                 # (N, W, L)


if __name__ == "__main__":
    key = jax.random.PRNGKey(0)

    # Small case matching the module's forward: batch=2, seq=16, channels=4, window=7.
    batch, seq_len, in_channels, window_size = 2, 16, 4, 7
    src = jax.random.normal(key, (batch, seq_len, in_channels), dtype=jnp.float32)
    out = jax.block_until_ready(nearest_neighbors_embed(src, window_size))
    ref = _reference(src, window_size)
    assert out.shape == (batch, window_size, seq_len)
    assert jnp.allclose(out, ref, atol=1e-5, rtol=1e-5)

    # Second case exercising the tiled (multi L-tile + halo-block) path.
    b2, l2, c2, w2 = 2, 4096, 8, 9
    src2 = jax.random.normal(jax.random.PRNGKey(0), (b2, l2, c2), dtype=jnp.float32)
    out2 = jax.block_until_ready(nearest_neighbors_embed(src2, w2))
    ref2 = _reference(src2, w2)
    assert out2.shape == (b2, w2, l2)
    assert jnp.allclose(out2, ref2, atol=1e-5, rtol=1e-5)

    print("KERNEL_OK")
</pallas_src>

<mosaic_0001>
module attributes {stable_mosaic.version = 11 : i64} {
  func.func @_avg_kernel(%arg0: i32, %arg1: i32, %arg2: memref<1x16x4xf32, #tpu.memory_space<vmem>>, %arg3: memref<1x16x1xf32, #tpu.memory_space<vmem>>) attributes {dimension_semantics = [#tpu.dimension_semantics<parallel>, #tpu.dimension_semantics<parallel>], iteration_bounds = array<i64: 2, 1>, scalar_prefetch = 0 : i64, scratch_operands = 0 : i64, tpu.core_type = #tpu.core_type<tc>, window_params = [{transform_indices = @transform_0, window_bounds = array<i64: 1, 16, 4>}, {transform_indices = @transform_1, window_bounds = array<i64: 1, 16, 1>}]} {
    %c0 = arith.constant 0 : index
    %c0_0 = arith.constant 0 : index
    %c0_1 = arith.constant 0 : index
    %0 = vector.load %arg2[%c0, %c0_0, %c0_1] : memref<1x16x4xf32, #tpu.memory_space<vmem>>, vector<1x16x4xf32>
    %1 = vector.shape_cast %0 : vector<1x16x4xf32> to vector<16x4xf32>
    %cst = arith.constant dense<0.000000e+00> : vector<16xf32>
    %2 = vector.multi_reduction <add>, %1, %cst [1] : vector<16x4xf32> to vector<16xf32>
    %3 = vector.shape_cast %2 : vector<16xf32> to vector<16x1xf32>
    %cst_2 = arith.constant 2.500000e-01 : f32
    %4 = vector.broadcast %cst_2 : f32 to vector<16x1xf32>
    %5 = arith.mulf %3, %4 : vector<16x1xf32>
    %c0_3 = arith.constant 0 : index
    %c0_4 = arith.constant 0 : index
    %c0_5 = arith.constant 0 : index
    %6 = vector.load %arg3[%c0_3, %c0_4, %c0_5] : memref<1x16x1xf32, #tpu.memory_space<vmem>>, vector<1x16x1xf32>
    %7 = vector.shape_cast %6 : vector<1x16x1xf32> to vector<16x1xf32>
    %8 = vector.shape_cast %5 : vector<16x1xf32> to vector<1x16x1xf32>
    tpu.vector_store %arg3[%c0_3, %c0_4, %c0_5], %8 {strides = array<i32>} : memref<1x16x1xf32, #tpu.memory_space<vmem>>, vector<1x16x1xf32>,
    return
  }
  func.func @transform_0(%arg0: i32, %arg1: i32) -> (i32, i32, i32) {
    %c0_i32 = arith.constant 0 : i32
    %c0_i32_0 = arith.constant 0 : i32
    return %arg0, %arg1, %c0_i32 : i32, i32, i32
  }
  func.func @transform_1(%arg0: i32, %arg1: i32) -> (i32, i32, i32) {
    %c0_i32 = arith.constant 0 : i32
    %c0_i32_0 = arith.constant 0 : i32
    return %arg0, %arg1, %c0_i32 : i32, i32, i32
  }
}

</mosaic_0001>

<bundles_post_ra>
// kernel: tpu_custom_call.1
= control target key start
LH: loop header
LB: loop body
LE: loop exit
PB: predicated region body
PF: predicated region fallthrough
CT: control target
= control target key end

     0   :  { %s328_s6 = smov 0   ;;  %s330_s7 = smov 0   ;;  %s358_s0 = inlined_call_operand.vmem [shape: f32[2,16,4], index: 0, kind: input, shape index: {}]   ;;  %s359_s1 = inlined_call_operand.vmem [shape: f32[2,16,1], index: 1, kind: output, shape index: {}]  }
   0x1   :  { %s332_s8 = smov 0  }
   0x2 LB: > { %s23_s9 = sadd.s32 1, %s312_s7  ;;  %p261_p0 = scmp.ge.s32.totalorder %s316_s8, 1  ;;  %s316_s8 = sphi %s332_s8, %s11_s8   ;;  %s312_s7 = sphi %s330_s7, %s361_s7   ;;  %s308_s6 = sphi %s328_s6, %s360_s6  }
   0x3   : > { %p25_p1 = scmp.ge.s32.totalorder %s23_s9, 2  ;;  %p108_p2 = scmp.lt.s32.totalorder %s316_s8, 3 }
   0x5   : > { %s363_s9 = smov (%p25_p1, %s23_s9), 0  ;;  %p109_p3 = pnand %p261_p0, %p108_p2 }
   0x6   : > { %p137_p4 = scmp.lt.s32.totalorder (!%p109_p3), %s308_s6, 1  ;;  %vm158_vm0 = vcmask (!%p109_p3), 31744   ;;  %vm167_vm1 = vcmask (!%p109_p3), 7168  }
   0x7   : > { %112 = sbr.rel (%p109_p3) target bundleno = 168 (0xa8), region = 24 }
   0xe   : > { %s365_s6 = smov (!%p137_p4, %s308_s6), 1 }
   0xf   : > { %s268_s10 = sshll.u32 %s365_s6, 4 }
  0x10   : > { %s144_s13 = scalar_lea.vmem %s358_s0, %s268_s10  ;;  %s154_s16 = scalar_lea.vmem %s359_s1, %s268_s10 }
  0x11   : > { %v156_v0 = vld [vmem:[%s144_s13] sm:$0xff]  ;;  %v157_v1 = vld [vmem:[%s144_s13 + $0x8] sm:$0xff] }
  0x12   : > { %v159_v2 = vsel %vm158_vm0, %v156_v0, 0.0  ;;  %v162_v3 = vsel %vm158_vm0, %v157_v1, 0.0 }
  0x13   : > { %160 = vadd.xlane.f32.xlu0 %v159_v2 }
  0x17   : > { %163 = vadd.xlane.f32.xlu0 %v162_v3 }
  0xa0   : > { %v161_v4 = vpop.xlane.xlu0 %160 }
  0xa1   : > { %v165_v5 = vmul.f32 0.25, %v161_v4 }
  0xa3   : > { %168 = vst.msk [vmem:[%s154_s16] sm:$0xff] %vm167_vm1, %v165_v5 }
  0xa4   : > { %v164_v6 = vpop.xlane.xlu0 %163 }
  0xa5   : > { %v166_v7 = vmul.f32 0.25, %v164_v6 }
  0xa7   : > { %169 = vst.msk [vmem:[%s154_s16 + $0x8] sm:$0xff] %vm167_vm1, %v166_v7 }
  0xa8 PF: > { %s11_s8 = sadd.s32 1, %s316_s8   ;;  %s360_s6 = smov %s312_s7 }
  0xa9   : > { %p8_p5 = scmp.ge.s32.totalorder %s11_s8, 4   ;;  %s361_s7 = smov %s363_s9 }
  0xab   :  { %10 = sbr.rel (!%p8_p5) target bundleno = 2 (0x2), region = 54 }

</bundles_post_ra>
